<compile_context>
chip_gen: v5e
topology: v5e:2x2
jax: 0.10.0
libtpu: 0.0.40
codegen_flags: <defaults>
</compile_context>

<pallas_src>
import functools

import jax
import jax.numpy as jnp
from jax.experimental import pallas as pl
from jax.experimental.pallas import tpu as pltpu

D_IN = 6
D_OUT = 6
NUM_HEADS = 2
HEAD_DIM = D_OUT // NUM_HEADS
CONTEXT_LEN = 8  # num_tokens used below


def mha_kernel(x_ref, wqkv_ref, wo_ref, bo_ref, o_ref, *, batch, seq):
    """Single-invocation multi-head attention forward.

    x_ref    : (B*T, D_IN)      flattened tokens (row = b*T + t)
    wqkv_ref : (D_IN, 3*D_OUT)  [Wq * 1/sqrt(head_dim) | Wk | Wv]
    wo_ref   : (D_OUT, D_OUT)   output projection weight
    bo_ref   : (1, D_OUT)       output projection bias
    o_ref    : (B*T, D_OUT)
    """
    x = x_ref[...]

    # One fused projection matmul for Q, K and V (single MXU op).
    qkv = jnp.dot(x, wqkv_ref[...], preferred_element_type=jnp.float32)  # (B*T, 3*D_OUT)

    def split_heads(block):
        # -> (NUM_HEADS * B, T, HEAD_DIM); leading index n = h * B + b.
        # The (B*T) -> (B, T) row split is sublane-tile aligned (T == 8).
        parts = []
        for h in range(NUM_HEADS):
            c0 = block * D_OUT + h * HEAD_DIM
            parts.append(qkv[:, c0:c0 + HEAD_DIM].reshape(batch, seq, HEAD_DIM))
        return jnp.concatenate(parts, axis=0)

    q = split_heads(0)   # attention scale already folded into the weights
    k = split_heads(1)
    v = split_heads(2)

    # Batched attention over all (head, batch) pairs at once; the contraction
    # is written as an einsum so no explicit transpose of K is emitted.
    s = jnp.einsum('nqd,nkd->nqk', q, k, preferred_element_type=jnp.float32)
    # NOTE: no causal mask — the reference's non in-place masked_fill result
    # is discarded, so the mask never applies.
    s = s - jnp.max(s, axis=-1, keepdims=True)
    p = jnp.exp(s)
    # Exact reciprocal keeps tight f32 parity with the reference; switch to
    # approx=True (EUP fast path) when a ~1e-4 tolerance is acceptable.
    attn = p * pl.reciprocal(jnp.sum(p, axis=-1, keepdims=True), approx=False)
    # dropout(p=0.0) -> identity
    ctx = jnp.einsum('nqk,nkd->nqd', attn, v, preferred_element_type=jnp.float32)

    # Re-pack heads onto the lane axis -> (B*T, D_OUT), then one out-proj matmul.
    ctx_flat = jnp.concatenate(
        [ctx[h * batch:(h + 1) * batch].reshape(batch * seq, HEAD_DIM)
         for h in range(NUM_HEADS)],
        axis=-1)
    out = jnp.dot(ctx_flat, wo_ref[...], preferred_element_type=jnp.float32)
    o_ref[...] = (out + bo_ref[...]).astype(o_ref.dtype)


def multi_head_attention(x, wq, wk, wv, wo, bo):
    B, T, d_in = x.shape
    assert d_in == D_IN

    scale = 1.0 / (HEAD_DIM ** 0.5)
    # Fuse the three projection weights; fold the attention scale into W_query.
    wqkv = jnp.concatenate([wq * scale, wk, wv], axis=1)   # (D_IN, 3*D_OUT)
    x_flat = x.reshape(B * T, D_IN)                         # one contiguous slab
    bo2 = bo.reshape(1, D_OUT)

    out_flat = pl.pallas_call(
        functools.partial(mha_kernel, batch=B, seq=T),
        out_shape=jax.ShapeDtypeStruct((B * T, D_OUT), jnp.float32),
        # Whole-array VMEM blocks, no grid: a single kernel invocation.
        in_specs=[
            pl.BlockSpec(memory_space=pltpu.MemorySpace.VMEM),  # x_flat
            pl.BlockSpec(memory_space=pltpu.MemorySpace.VMEM),  # wqkv
            pl.BlockSpec(memory_space=pltpu.MemorySpace.VMEM),  # wo
            pl.BlockSpec(memory_space=pltpu.MemorySpace.VMEM),  # bo
        ],
        out_specs=pl.BlockSpec(memory_space=pltpu.MemorySpace.VMEM),
    )(x_flat, wqkv, wo, bo2)
    return out_flat.reshape(B, T, D_OUT)


def _reference(x, wq, wk, wv, wo, bo):
    """Pure-JAX reference mirroring the PyTorch forward (no mask, no dropout)."""
    B, T, _ = x.shape
    q = x @ wq
    k = x @ wk
    v = x @ wv
    q = q.reshape(B, T, NUM_HEADS, HEAD_DIM).transpose(0, 2, 1, 3)
    k = k.reshape(B, T, NUM_HEADS, HEAD_DIM).transpose(0, 2, 1, 3)
    v = v.reshape(B, T, NUM_HEADS, HEAD_DIM).transpose(0, 2, 1, 3)
    scores = jnp.einsum("bhqd,bhkd->bhqk", q, k) / (HEAD_DIM ** 0.5)
    attn = jax.nn.softmax(scores, axis=-1)
    ctx = jnp.einsum("bhqk,bhkd->bhqd", attn, v)
    ctx = ctx.transpose(0, 2, 1, 3).reshape(B, T, D_OUT)
    return ctx @ wo + bo


if __name__ == "__main__":
    B, T = 2, CONTEXT_LEN

    key = jax.random.PRNGKey(0)
    kx, kq, kk, kv, ko, kb = jax.random.split(key, 6)

    x = jax.random.normal(kx, (B, T, D_IN), dtype=jnp.float32)
    # Deterministic parameter init (shapes match nn.Linear(d_in, d_out), stored transposed).
    wq = jax.random.normal(kq, (D_IN, D_OUT), dtype=jnp.float32) * 0.1
    wk = jax.random.normal(kk, (D_IN, D_OUT), dtype=jnp.float32) * 0.1
    wv = jax.random.normal(kv, (D_IN, D_OUT), dtype=jnp.float32) * 0.1
    wo = jax.random.normal(ko, (D_OUT, D_OUT), dtype=jnp.float32) * 0.1
    bo = jax.random.normal(kb, (1, D_OUT), dtype=jnp.float32) * 0.1

    out = multi_head_attention(x, wq, wk, wv, wo, bo)
    out = jax.block_until_ready(out)

    ref = _reference(x, wq, wk, wv, wo, bo)
    assert out.shape == (B, T, D_OUT)
    assert jnp.allclose(out, ref, atol=1e-5, rtol=1e-5), "mismatch vs JAX reference"

    print("KERNEL_OK")
</pallas_src>

<mosaic_0001>
module attributes {stable_mosaic.version = 11 : i64} {
  func.func @mha_kernel(%arg0: memref<16x6xf32, #tpu.memory_space<vmem>>, %arg1: memref<6x18xf32, #tpu.memory_space<vmem>>, %arg2: memref<6x6xf32, #tpu.memory_space<vmem>>, %arg3: memref<1x6xf32, #tpu.memory_space<vmem>>, %arg4: memref<16x6xf32, #tpu.memory_space<vmem>>) attributes {dimension_semantics = [], scalar_prefetch = 0 : i64, scratch_operands = 0 : i64, tpu.core_type = #tpu.core_type<tc>} {
    %c0 = arith.constant 0 : index
    %c0_0 = arith.constant 0 : index
    %0 = vector.load %arg0[%c0, %c0_0] : memref<16x6xf32, #tpu.memory_space<vmem>>, vector<16x6xf32>
    %c0_1 = arith.constant 0 : index
    %c0_2 = arith.constant 0 : index
    %1 = vector.load %arg1[%c0_1, %c0_2] : memref<6x18xf32, #tpu.memory_space<vmem>>, vector<6x18xf32>
    %cst = arith.constant dense<0.000000e+00> : vector<16x18xf32>
    %2 = tpu.matmul %0, %1, %cst {dimension_numbers = #tpu.dot_dimension_numbers<[1], [0], [0], [1], [0, 0, 1, 1], [], []>} : vector<16x6xf32>, vector<6x18xf32>, vector<16x18xf32> -> vector<16x18xf32>
    %3 = vector.extract_strided_slice %2 {offsets = [0, 0], sizes = [16, 3], strides = [1, 1]} : vector<16x18xf32> to vector<16x3xf32>
    %4 = vector.shape_cast %3 : vector<16x3xf32> to vector<2x8x3xf32>
    %5 = vector.extract_strided_slice %2 {offsets = [0, 3], sizes = [16, 3], strides = [1, 1]} : vector<16x18xf32> to vector<16x3xf32>
    %6 = vector.shape_cast %5 : vector<16x3xf32> to vector<2x8x3xf32>
    %7 = tpu.concatenate %4, %6 in 0 : vector<2x8x3xf32>, vector<2x8x3xf32> -> vector<4x8x3xf32>
    %8 = vector.extract_strided_slice %2 {offsets = [0, 6], sizes = [16, 3], strides = [1, 1]} : vector<16x18xf32> to vector<16x3xf32>
    %9 = vector.shape_cast %8 : vector<16x3xf32> to vector<2x8x3xf32>
    %10 = vector.extract_strided_slice %2 {offsets = [0, 9], sizes = [16, 3], strides = [1, 1]} : vector<16x18xf32> to vector<16x3xf32>
    %11 = vector.shape_cast %10 : vector<16x3xf32> to vector<2x8x3xf32>
    %12 = tpu.concatenate %9, %11 in 0 : vector<2x8x3xf32>, vector<2x8x3xf32> -> vector<4x8x3xf32>
    %13 = vector.extract_strided_slice %2 {offsets = [0, 12], sizes = [16, 3], strides = [1, 1]} : vector<16x18xf32> to vector<16x3xf32>
    %14 = vector.shape_cast %13 : vector<16x3xf32> to vector<2x8x3xf32>
    %15 = vector.extract_strided_slice %2 {offsets = [0, 15], sizes = [16, 3], strides = [1, 1]} : vector<16x18xf32> to vector<16x3xf32>
    %16 = vector.shape_cast %15 : vector<16x3xf32> to vector<2x8x3xf32>
    %17 = tpu.concatenate %14, %16 in 0 : vector<2x8x3xf32>, vector<2x8x3xf32> -> vector<4x8x3xf32>
    "tpu.trace_start"() <{level = 10 : i32, message = "nqd,nkd->nqk"}> : () -> ()
    %cst_3 = arith.constant dense<0.000000e+00> : vector<4x8x8xf32>
    %18 = tpu.matmul %7, %12, %cst_3 {dimension_numbers = #tpu.dot_dimension_numbers<[2], [2], [1], [1], [0, 0, 0, 1, 1, 1], [0], [0]>} : vector<4x8x3xf32>, vector<4x8x3xf32>, vector<4x8x8xf32> -> vector<4x8x8xf32>
    "tpu.trace_stop"() : () -> ()
    %cst_4 = arith.constant dense<0xFF800000> : vector<4x8xf32>
    %19 = vector.multi_reduction <maximumf>, %18, %cst_4 [2] : vector<4x8x8xf32> to vector<4x8xf32>
    %20 = vector.shape_cast %19 : vector<4x8xf32> to vector<4x8x1xf32>
    %21 = vector.broadcast %20 : vector<4x8x1xf32> to vector<4x8x8xf32>
    %22 = arith.subf %18, %21 : vector<4x8x8xf32>
    %23 = math.exp %22 : vector<4x8x8xf32>
    %cst_5 = arith.constant dense<0.000000e+00> : vector<4x8xf32>
    %24 = vector.multi_reduction <add>, %23, %cst_5 [2] : vector<4x8x8xf32> to vector<4x8xf32>
    %25 = vector.shape_cast %24 : vector<4x8xf32> to vector<4x8x1xf32>
    %26 = tpu.reciprocal %25 : vector<4x8x1xf32> -> vector<4x8x1xf32>
    %27 = vector.broadcast %26 : vector<4x8x1xf32> to vector<4x8x8xf32>
    %28 = arith.mulf %23, %27 : vector<4x8x8xf32>
    "tpu.trace_start"() <{level = 10 : i32, message = "nqk,nkd->nqd"}> : () -> ()
    %cst_6 = arith.constant dense<0.000000e+00> : vector<4x8x3xf32>
    %29 = tpu.matmul %28, %17, %cst_6 {dimension_numbers = #tpu.dot_dimension_numbers<[2], [1], [1], [2], [0, 0, 0, 1, 1, 2], [0], [0]>} : vector<4x8x8xf32>, vector<4x8x3xf32>, vector<4x8x3xf32> -> vector<4x8x3xf32>
    "tpu.trace_stop"() : () -> ()
    %30 = vector.extract_strided_slice %29 {offsets = [0, 0, 0], sizes = [2, 8, 3], strides = [1, 1, 1]} : vector<4x8x3xf32> to vector<2x8x3xf32>
    %31 = vector.shape_cast %30 : vector<2x8x3xf32> to vector<16x3xf32>
    %32 = vector.extract_strided_slice %29 {offsets = [2, 0, 0], sizes = [2, 8, 3], strides = [1, 1, 1]} : vector<4x8x3xf32> to vector<2x8x3xf32>
    %33 = vector.shape_cast %32 : vector<2x8x3xf32> to vector<16x3xf32>
    %34 = tpu.concatenate %31, %33 in 1 : vector<16x3xf32>, vector<16x3xf32> -> vector<16x6xf32>
    %c0_7 = arith.constant 0 : index
    %c0_8 = arith.constant 0 : index
    %35 = vector.load %arg2[%c0_7, %c0_8] : memref<6x6xf32, #tpu.memory_space<vmem>>, vector<6x6xf32>
    %cst_9 = arith.constant dense<0.000000e+00> : vector<16x6xf32>
    %36 = tpu.matmul %34, %35, %cst_9 {dimension_numbers = #tpu.dot_dimension_numbers<[1], [0], [0], [1], [0, 0, 1, 1], [], []>} : vector<16x6xf32>, vector<6x6xf32>, vector<16x6xf32> -> vector<16x6xf32>
    %c0_10 = arith.constant 0 : index
    %c0_11 = arith.constant 0 : index
    %37 = vector.load %arg3[%c0_10, %c0_11] : memref<1x6xf32, #tpu.memory_space<vmem>>, vector<1x6xf32>
    %38 = vector.broadcast %37 : vector<1x6xf32> to vector<16x6xf32>
    %39 = arith.addf %36, %38 : vector<16x6xf32>
    %c0_12 = arith.constant 0 : index
    %c0_13 = arith.constant 0 : index
    %40 = vector.load %arg4[%c0_12, %c0_13] : memref<16x6xf32, #tpu.memory_space<vmem>>, vector<16x6xf32>
    tpu.vector_store %arg4[%c0_12, %c0_13], %39 {strides = array<i32>} : memref<16x6xf32, #tpu.memory_space<vmem>>, vector<16x6xf32>,
    return
  }
}

</mosaic_0001>

<bundles_post_ra>
// kernel: tpu_custom_call.1
= control target key start
LH: loop header
LB: loop body
LE: loop exit
PB: predicated region body
PF: predicated region fallthrough
CT: control target
= control target key end

     0   :  { %vm27_vm0 = vcmask 1045504   ;;  %vm20_vm1 = vcmask 48128   ;;  %s463_s21 = smov 122   ;;  %vm62_vm2 = vcmask 23552   ;;  %vm165_vm3 = vcmask 64512   ;;  %s466_s22 = smov 3   ;;  %s566_s1 = inlined_call_operand.vmem [shape: f32[6,18], index: 1, kind: input, shape index: {}]   ;;  %s567_s0 = inlined_call_operand.vmem [shape: f32[16,6], index: 0, kind: input, shape index: {}]   ;;  %s568_s3 = inlined_call_operand.vmem [shape: f32[1,6], index: 3, kind: input, shape index: {}]   ;;  %s569_s2 = inlined_call_operand.vmem [shape: f32[6,6], index: 2, kind: input, shape index: {}]   ;;  %s570_s4 = inlined_call_operand.vmem [shape: f32[16,6], index: 4, kind: output, shape index: {}]  }
   0x1   :  { %v19_v0 = vld [vmem:[%s566_s1] sm:$0x3f]  ;;  %v18_v2 = vld [vmem:[%s567_s0 + $0x8] sm:$0xff]  ;;  %s464_s1 = smov 125  }
   0x2   :  { %v17_v1 = vld [vmem:[%s567_s0] sm:$0xff]  ;;  %419 = vmatpush.msk.msra.mxu0 %vm27_vm0, %v19_v0  ;;  %s465_s0 = smov 116  }
   0x3   :  { %420 = vmatmul.msk.f32.vlgmr.msra.gmra.mxu0 %vm20_vm1, %v17_v1 }
   0xb   :  { %421 = vmatmul.msk.f32.gmra.mxu0 %vm20_vm1, %v18_v2 }
  0x80   :  { %v504_v3 = vpop.f32.mrf.mxu0 }
  0x81   :  { %60 = vrot.lane.b32.xlu2 %v504_v3, %s463_s21  ;;  %56 = vrot.lane.b32.xlu0 %v504_v3, %s464_s1 }
  0x88   :  { %v508_v4 = vpop.f32.mrf.mxu0 }
  0x89   :  { %87 = vrot.lane.b32.xlu1 %v508_v4, %s463_s21  ;;  %58 = vrot.lane.b32.xlu0 %v508_v4, %s464_s1 }
  0xdb   :  { %v61_v5 = vpop.permute.xlu2 %60 }
  0xdc   :  { %422 = vmatpush.xpose.msk.msra.mxu1 %vm62_vm2, %v61_v5 }
  0xdf   :  { %423 = vmatmul.msk.f32.vlgmr.msra.gmra.mxu1 %vm62_vm2, %v504_v3 }
  0xf3   :  { %v57_v6 = vpop.permute.xlu0 %56 }
  0xf4   :  { %113 = vrot.lane.b32.xlu1 %v57_v6, %s463_s21 }
  0xfb   :  { %v88_v7 = vpop.permute.xlu1 %87  ;;  %v59_v8 = vpop.permute.xlu0 %58 }
  0xfc   :  { %424 = vmatpush.xpose.msk.msra.mxu3 %vm62_vm2, %v88_v7  ;;  %139 = vrot.lane.b32.xlu2 %v59_v8, %s463_s21  ;;  %v441_v15 = vpack.i.bf16 %v59_v8, %v57_v6 }
  0xff   :  { %425 = vmatmul.msk.f32.vlgmr.msra.gmra.mxu3 %vm62_vm2, %v508_v4 }
 0x156   :  { %v140_v9 = vpop.permute.xlu2 %139 }
 0x157   :  { %428 = vmatpush.xpose.msk.msrb.mxu1 %vm62_vm2, %v140_v9 }
 0x15a   :  { %429 = vmatmul.msk.f32.vlgmr.msrb.gmra.mxu1 %vm62_vm2, %v59_v8 }
 0x15c   :  { %v84_v10 = vpop.f32.mrf.mxu1 }
 0x15d   :  { %v166_v11 = vsel %vm165_vm3, %v84_v10, -inf }
 0x15e   :  { %167 = vmax.xlane.f32.xlu2 %v166_v11 }
 0x166   :  { %v114_v12 = vpop.permute.xlu1 %113 }
 0x167   :  { %426 = vmatpush.xpose.msk.msrb.mxu3 %vm62_vm2, %v114_v12 }
 0x16a   :  { %427 = vmatmul.msk.f32.vlgmr.msrb.gmra.mxu3 %vm62_vm2, %v57_v6 }
 0x182   :  { %v110_v13 = vpop.f32.mrf.mxu3 }
 0x183   :  { %v169_v14 = vsel %vm165_vm3, %v110_v13, -inf }
 0x184   :  { %170 = vmax.xlane.f32.xlu2 %v169_v14 }
 0x19c   :  { %442 = vrot.lane.b32.xlu2 %v441_v15, %s465_s0 }
 0x1d1   :  { %v168_v20 = vpop.xlane.xlu2 %167 }
 0x1d2   :  { %v178_v36 = vsub.f32 %v84_v10, %v168_v20 }
 0x1d4   :  { %v182_v38 = vmul.f32 1.442695, %v178_v36 }
 0x1d7   :  { %v162_v16 = vpop.f32.mrf.mxu1 }
 0x1d8   :  { %v175_v17 = vsel %vm165_vm3, %v162_v16, -inf }
 0x1d9   :  { %176 = vmax.xlane.f32.xlu1 %v175_v17 }
 0x1ed   :  { %v136_v18 = vpop.f32.mrf.mxu3 }
 0x1ee   :  { %v172_v19 = vsel %vm165_vm3, %v136_v18, -inf }
 0x1ef   :  { %173 = vmax.xlane.f32.xlu0 %v172_v19 }
 0x1f7   :  { %v171_v21 = vpop.xlane.xlu2 %170 }
 0x1f8   :  { %v179_v27 = vsub.f32 %v110_v13, %v171_v21 }
 0x1fa   :  { %v184_v29 = vmul.f32 1.442695, %v179_v27 }
 0x1ff   :  { %v443_v22 = vpop.permute.xlu2 %442 }
 0x200   :  { %v445_v23 = vunpack.i.h.bf16 %v443_v22  ;;  %v444_v24 = vunpack.i.l.bf16 %v443_v22 }
 0x202   :  { %335 = vmatpush.msrb.mxu0 %v444_v24  ;;  %361 = vmatpush.msra.mxu1 %v445_v23 }
 0x24c   :  { %v177_v25 = vpop.xlane.xlu1 %176 }
 0x24d   :  { %v181_v26 = vsub.f32 %v162_v16, %v177_v25 }
 0x24f   :  { %v188_v28 = vmul.f32 1.442695, %v181_v26 }
 0x251   :  { %447 = vpow2.f32 %v188_v28 }
 0x252   :  { %449 = vpow2.f32 %v184_v29 }
 0x257   :  { %v448_v30 = vpop.eup %447 }
 0x258   :  { %v199_v31 = vsel %vm165_vm3, %v448_v30, 0.0  ;;  %v450_v32 = vpop.eup %449 }
 0x259   :  { %200 = vadd.xlane.f32.xlu1 %v199_v31  ;;  %v193_v33 = vsel %vm165_vm3, %v450_v32, 0.0 }
 0x261   :  { %194 = vadd.xlane.f32.xlu1 %v193_v33 }
 0x262   :  { %v174_v34 = vpop.xlane.xlu0 %173 }
 0x263   :  { %v180_v35 = vsub.f32 %v136_v18, %v174_v34 }
 0x265   :  { %v186_v37 = vmul.f32 1.442695, %v180_v35 }
 0x267   :  { %451 = vpow2.f32 %v186_v37 }
 0x268   :  { %453 = vpow2.f32 %v182_v38  ;;  %v446_v38 = vld [vmem:[%s568_s3] ss:$0 sm:$0xff] }
 0x26d   :  { %v529_v39 = vpop.eup %451 }
 0x26e   :  { %v196_v40 = vsel %vm165_vm3, %v529_v39, 0.0  ;;  %v533_v41 = vpop.eup %453 }
 0x26f   :  { %197 = vadd.xlane.f32.xlu0 %v196_v40  ;;  %v190_v42 = vsel %vm165_vm3, %v533_v41, 0.0 }
 0x277   :  { %191 = vadd.xlane.f32.xlu0 %v190_v42 }
 0x27a   :  { %288 = vrot.lane.b32.xlu1 %v508_v4, %s465_s0 }
 0x28b   :  { %262 = vrot.lane.b32.xlu0 %v504_v3, %s465_s0 }
 0x2cc   :  { %v201_v43 = vpop.xlane.xlu1 %200 }
 0x2cd   :  { %455 = vrcp.f32 %v201_v43  ;;  %v255_v48 = vand.u32 2147483648, %v201_v43  ;;  %v253_v50 = vand.u32 2147483647, %v201_v43  ;;  %vm249_vm5 = vweird.f32 %v201_v43 }
 0x2cf   :  { %v256_v53 = vor.u32 1.1754944e-38, %v255_v48  ;;  %vm254_vm7 = vcmp.eq.f32.partialorder %v253_v50, 8.507059e+37 }
 0x2d3   :  { %v456_v44 = vpop.eup %455 }
 0x2d4   :  { %v245_v45 = vmul.f32 %v456_v44, %v201_v43  ;;  %v195_v46 = vpop.xlane.xlu1 %194  ;;  %vm250_vm4 = vweird.f32 %v456_v44 }
 0x2d5   :  { %457 = vrcp.f32 %v195_v46  ;;  %vm251_vm6 = vmor %vm249_vm5, %vm250_vm4  ;;  %v227_v62 = vand.u32 2147483648, %v195_v46  ;;  %vm221_vm9 = vweird.f32 %v195_v46  ;;  %v225_v63 = vand.u32 2147483647, %v195_v46 }
 0x2d6   :  { %v246_v47 = vsub.f32 1.0, %v245_v45 }
 0x2d7   :  { %v228_v1 = vor.u32 1.1754944e-38, %v227_v62  ;;  %vm226_vm11 = vcmp.eq.f32.partialorder %v225_v63, 8.507059e+37 }
 0x2d8   :  { %v247_v49 = vmul.f32 %v456_v44, %v246_v47 }
 0x2da   :  { %v248_v51 = vadd.f32 %v456_v44, %v247_v49 }
 0x2db   :  { %v458_v52 = vpop.eup %457 }
 0x2dc   :  { %v252_v54 = vsel %vm251_vm6, %v456_v44, %v248_v51  ;;  %v217_v55 = vmul.f32 %v458_v52, %v195_v46  ;;  %vm222_vm8 = vweird.f32 %v458_v52 }
 0x2dd   :  { %v257_v56 = vsel %vm254_vm7, %v256_v53, %v252_v54  ;;  %vm223_vm10 = vmor %vm221_vm9, %vm222_vm8 }
 0x2de   :  { %v218_v57 = vsub.f32 1.0, %v217_v55  ;;  %v261_v58 = vmul.f32 %v448_v30, %v257_v56  ;;  %v376_v30 = vld [vmem:[%s569_s2] sm:$0x3f] }
 0x2e0   :  { %v219_v59 = vmul.f32 %v458_v52, %v218_v57  ;;  %433 = vmatmul.msk.f32.vlgmr.msra.gmra.mxu1 %vm165_vm3, %v261_v58 }
 0x2e2   :  { %v220_v60 = vadd.f32 %v458_v52, %v219_v59  ;;  %v198_v61 = vpop.xlane.xlu0 %197 }
 0x2e3   :  { %459 = vrcp.f32 %v198_v61  ;;  %v241_v9 = vand.u32 2147483648, %v198_v61  ;;  %v239_v11 = vand.u32 2147483647, %v198_v61  ;;  %vm235_vm13 = vweird.f32 %v198_v61 }
 0x2e4   :  { %v224_v0 = vsel %vm223_vm10, %v458_v52, %v220_v60 }
 0x2e5   :  { %v229_v3 = vsel %vm226_vm11, %v228_v1, %v224_v0  ;;  %v242_v14 = vor.u32 1.1754944e-38, %v241_v9  ;;  %vm240_vm15 = vcmp.eq.f32.partialorder %v239_v11, 8.507059e+37 }
 0x2e6   :  { %v259_v8 = vmul.f32 %v450_v32, %v229_v3 }
 0x2e9   :  { %v460_v2 = vpop.eup %459 }
 0x2ea   :  { %v231_v4 = vmul.f32 %v460_v2, %v198_v61  ;;  %v192_v5 = vpop.xlane.xlu0 %191  ;;  %vm236_vm12 = vweird.f32 %v460_v2 }
 0x2eb   :  { %461 = vrcp.f32 %v192_v5  ;;  %vm237_vm14 = vmor %vm235_vm13, %vm236_vm12  ;;  %v213_v20 = vand.u32 2147483648, %v192_v5  ;;  %v211_v22 = vand.u32 2147483647, %v192_v5  ;;  %vm207_vm5 = vweird.f32 %v192_v5 }
 0x2ec   :  { %v232_v6 = vsub.f32 1.0, %v231_v4  ;;  %v289_v7 = vpop.permute.xlu1 %288 }
 0x2ed   :  { %309 = vmatpush.msra.mxu3 %v289_v7  ;;  %v214_v24 = vor.u32 1.1754944e-38, %v213_v20  ;;  %vm212_vm7 = vcmp.eq.f32.partialorder %v211_v22, 8.507059e+37 }
 0x2ee   :  { %v233_v10 = vmul.f32 %v460_v2, %v232_v6  ;;  %431 = vmatmul.msk.f32.vlgmr.msra.gmra.mxu3 %vm165_vm3, %v259_v8 }
 0x2f0   :  { %v234_v12 = vadd.f32 %v460_v2, %v233_v10 }
 0x2f1   :  { %v462_v13 = vpop.eup %461 }
 0x2f2   :  { %v203_v15 = vmul.f32 %v462_v13, %v192_v5  ;;  %v238_v16 = vsel %vm237_vm14, %v460_v2, %v234_v12  ;;  %vm208_vm4 = vweird.f32 %v462_v13 }
 0x2f3   :  { %v243_v17 = vsel %vm240_vm15, %v242_v14, %v238_v16  ;;  %vm209_vm6 = vmor %vm207_vm5, %vm208_vm4 }
 0x2f4   :  { %v204_v18 = vsub.f32 1.0, %v203_v15  ;;  %v260_v19 = vmul.f32 %v529_v39, %v243_v17 }
 0x2f6   :  { %v205_v21 = vmul.f32 %v462_v13, %v204_v18  ;;  %432 = vmatmul.msk.f32.vlgmr.msrb.gmra.mxu0 %vm165_vm3, %v260_v19 }
 0x2f8   :  { %v206_v23 = vadd.f32 %v462_v13, %v205_v21 }
 0x2fa   :  { %v210_v25 = vsel %vm209_vm6, %v462_v13, %v206_v23 }
 0x2fb   :  { %v215_v26 = vsel %vm212_vm7, %v214_v24, %v210_v25 }
 0x2fc   :  { %v258_v27 = vmul.f32 %v533_v41, %v215_v26 }
 0x2fd   :  { %v263_v28 = vpop.permute.xlu0 %262 }
 0x2fe   :  { %283 = vmatpush.msra.mxu2 %v263_v28 }
 0x2ff   :  { %430 = vmatmul.msk.f32.vlgmr.msra.gmra.mxu2 %vm165_vm3, %v258_v27 }
 0x300   :  { %434 = vmatpush.msk.msrb.mxu2 %vm27_vm0, %v376_v30 }
 0x35d   :  { %v363_v29 = vpop.f32.mrf.mxu1 }
 0x35e   :  { %370 = vrot.lane.b32.xlu0 %v363_v29, %s466_s22 }
 0x371   :  { %v311_v36 = vpop.f32.mrf.mxu3 }
 0x373   :  { %v337_v31 = vpop.f32.mrf.mxu0 }
 0x374   :  { %368 = vrot.lane.b32.xlu2 %v337_v31, %s466_s22 }
 0x382   :  { %v285_v32 = vpop.f32.mrf.mxu2 }
 0x3ce   :  { %v369_v33 = vpop.permute.xlu2 %368 }
 0x3cf   :  { %v374_v34 = vsel %vm62_vm2, %v285_v32, %v369_v33 }
 0x3d0   :  { %435 = vmatmul.msk.f32.vlgmr.msrb.gmra.mxu2 %vm20_vm1, %v374_v34  ;;  %v371_v35 = vpop.permute.xlu0 %370 }
 0x3d1   :  { %v375_v37 = vsel %vm62_vm2, %v311_v36, %v371_v35 }
 0x3d8   :  { %436 = vmatmul.msk.f32.gmra.mxu2 %vm20_vm1, %v375_v37 }
 0x453   :  { %v407_v39 = vpop.f32.mrf.mxu2 }
 0x454   :  { %v408_v40 = vadd.f32 %v446_v38, %v407_v39 }
 0x456   :  { %413 = vst.msk [vmem:[%s570_s4] sm:$0xff] %vm20_vm1, %v408_v40 }
 0x45b   :  { %v410_v41 = vpop.f32.mrf.mxu2 }
 0x45c   :  { %v411_v42 = vadd.f32 %v446_v38, %v410_v41 }
 0x45e   :  { %414 = vst.msk [vmem:[%s570_s4 + $0x8] sm:$0xff] %vm20_vm1, %v411_v42 }

</bundles_post_ra>
